<compile_context>
chip_gen: v6e
topology: v6e:2x2x1
jax: 0.10.0
libtpu: 0.0.40
codegen_flags: <defaults>
</compile_context>

<pallas_src>
import functools

import jax
import jax.numpy as jnp
from jax.experimental import pallas as pl
from jax.experimental.pallas import tpu as pltpu

_MIN_BLOCK_BYTES = 512 * 1024


def _gen_params():
    """Per-generation (block-byte budget, vmem limit, minimum grid depth)."""
    try:
        kind = jax.devices()[0].device_kind.lower()
    except Exception:  # pragma: no cover - defensive
        kind = ""
    if "v7" in kind:
        # 64 MiB physical VMEM, 2 TensorCores: smaller blocks, deeper grid.
        return 2 << 20, 48 << 20, 8
    if "v5" in kind or "v6" in kind:
        # 128 MiB physical VMEM, single TensorCore: bigger blocks, shallow grid.
        return 4 << 20, 64 << 20, 2
    # Unknown chip: conservative settings that are safe everywhere.
    return 2 << 20, 32 << 20, 4


def _pick_tile(extent, bytes_per_unit, align, target_bytes, min_steps):
    """Largest `align`-multiple tile giving ~target_bytes blocks; keep the grid
    >= min_steps deep when that does not push blocks below ~512 KiB."""
    bytes_per_unit = max(bytes_per_unit, 1)
    tile = max(align, (target_bytes // bytes_per_unit) // align * align)
    if min_steps > 1:
        shrunk = (extent // min_steps) // align * align
        floor = max(align, (_MIN_BLOCK_BYTES // bytes_per_unit) // align * align)
        if shrunk >= floor:
            tile = min(tile, shrunk)
    if tile >= extent:
        return extent  # single full-extent block (handles extent % align != 0)
    return tile


# ---------------------------------------------------------------------------
# channels_last, generic path: normalize the last (lane) axis of (N, C) rows.
# ---------------------------------------------------------------------------
def _ln_rows_kernel(x_ref, w_ref, b_ref, o_ref, *, eps, inv_c):
    # x_ref: (tile_n, C)   w_ref/b_ref: (1, C)
    x = x_ref[...].astype(jnp.float32)
    mean = jnp.sum(x, axis=-1, keepdims=True) * inv_c
    d = x - mean                                    # centered, resident in vregs
    var = jnp.sum(d * d, axis=-1, keepdims=True) * inv_c
    inv = jax.lax.rsqrt(var + eps)
    w = w_ref[...].astype(jnp.float32)
    b = b_ref[...].astype(jnp.float32)
    o_ref[...] = (d * inv * w + b).astype(o_ref.dtype)


def _layer_norm_rows(x2d, weight, bias, eps, *, target_bytes, vmem_limit, min_steps):
    N, C = x2d.shape
    itemsize = x2d.dtype.itemsize
    align = max(8, 32 // itemsize)                 # dtype sublane packing
    tile_n = _pick_tile(N, C * (itemsize + 4), align, target_bytes, min_steps)
    kernel = functools.partial(_ln_rows_kernel, eps=float(eps), inv_c=1.0 / C)
    return pl.pallas_call(
        kernel,
        out_shape=jax.ShapeDtypeStruct((N, C), x2d.dtype),
        grid_spec=pltpu.PrefetchScalarGridSpec(
            num_scalar_prefetch=0,
            grid=(pl.cdiv(N, tile_n),),
            in_specs=[
                pl.BlockSpec((tile_n, C), lambda i: (i, 0)),
                pl.BlockSpec((1, C), lambda i: (0, 0)),
                pl.BlockSpec((1, C), lambda i: (0, 0)),
            ],
            out_specs=pl.BlockSpec((tile_n, C), lambda i: (i, 0)),
        ),
        compiler_params=pltpu.CompilerParams(
            dimension_semantics=("parallel",),
            vmem_limit_bytes=vmem_limit),
    )(x2d, weight.reshape(1, C), bias.reshape(1, C))


# ---------------------------------------------------------------------------
# channels_last, packed path for C < 128: G = 128 // C rows per lane group.
# Segmented stats on the idle MXU keep stores lane-dense (no masked vst).
# ---------------------------------------------------------------------------
def _ln_rows_packed_kernel(x_ref, w_ref, b_ref, seg_ref, segt_ref, o_ref, *,
                           eps, inv_c):
    # x_ref: (tile_n, G*C)  w/b: (1, G*C)  seg: (G*C, G)  segt: (G, G*C)
    x = x_ref[...].astype(jnp.float32)
    seg = seg_ref[...]
    segt = segt_ref[...]
    s1 = jnp.dot(x, seg, preferred_element_type=jnp.float32)          # (tile_n, G)
    mean = s1 * inv_c
    d = x - jnp.dot(mean, segt, preferred_element_type=jnp.float32)   # centered
    s2 = jnp.dot(d * d, seg, preferred_element_type=jnp.float32)
    inv = jax.lax.rsqrt(s2 * inv_c + eps)
    inv_full = jnp.dot(inv, segt, preferred_element_type=jnp.float32)
    w = w_ref[...].astype(jnp.float32)
    b = b_ref[...].astype(jnp.float32)
    o_ref[...] = (d * inv_full * w + b).astype(o_ref.dtype)


def _layer_norm_rows_packed(x2d, weight, bias, eps, *, target_bytes, vmem_limit,
                            min_steps):
    N, C = x2d.shape
    G = 128 // C
    NP = N // G
    xp = x2d.reshape(NP, G * C)                     # free row-major reshape
    itemsize = x2d.dtype.itemsize
    align = max(8, 32 // itemsize)
    tile_n = _pick_tile(NP, G * C * (itemsize + 4), align, target_bytes, min_steps)

    wp = jnp.tile(weight.reshape(1, C).astype(jnp.float32), (1, G))   # (1, G*C)
    bp = jnp.tile(bias.reshape(1, C).astype(jnp.float32), (1, G))
    seg = (jnp.arange(G * C)[:, None] // C == jnp.arange(G)[None, :]
           ).astype(jnp.float32)                                      # (G*C, G)
    segt = seg.T                                                      # (G, G*C)

    kernel = functools.partial(_ln_rows_packed_kernel, eps=float(eps), inv_c=1.0 / C)
    yp = pl.pallas_call(
        kernel,
        out_shape=jax.ShapeDtypeStruct((NP, G * C), x2d.dtype),
        grid_spec=pltpu.PrefetchScalarGridSpec(
            num_scalar_prefetch=0,
            grid=(pl.cdiv(NP, tile_n),),
            in_specs=[
                pl.BlockSpec((tile_n, G * C), lambda i: (i, 0)),
                pl.BlockSpec((1, G * C), lambda i: (0, 0)),
                pl.BlockSpec((1, G * C), lambda i: (0, 0)),
                pl.BlockSpec((G * C, G), lambda i: (0, 0)),
                pl.BlockSpec((G, G * C), lambda i: (0, 0)),
            ],
            out_specs=pl.BlockSpec((tile_n, G * C), lambda i: (i, 0)),
        ),
        compiler_params=pltpu.CompilerParams(
            dimension_semantics=("parallel",),
            vmem_limit_bytes=vmem_limit),
    )(xp, wp, bp, seg, segt)
    return yp.reshape(N, C)


# ---------------------------------------------------------------------------
# channels_first: native NCHW layout.
#   Main path (HW % 128 == 0): view as (B, C, HW//128, 128); C is a leading
#   dim, so the reduce is a plain VPU accumulation over C lane-dense slabs.
# ---------------------------------------------------------------------------
def _ln_cf4_kernel(x_ref, w_ref, b_ref, o_ref, *, eps, inv_c):
    # x_ref: (1, C, tile_r, 128)   w_ref/b_ref: (1, C, 1, 128)
    x = x_ref[...].astype(jnp.float32)
    mean = jnp.sum(x, axis=1, keepdims=True) * inv_c       # (1, 1, tile_r, 128)
    d = x - mean
    var = jnp.sum(d * d, axis=1, keepdims=True) * inv_c
    inv = jax.lax.rsqrt(var + eps)
    w = w_ref[...].astype(jnp.float32)
    b = b_ref[...].astype(jnp.float32)
    o_ref[...] = (d * inv * w + b).astype(o_ref.dtype)


def _ln_cf3_kernel(x_ref, w_ref, b_ref, o_ref, *, eps, inv_c):
    # Fallback layout: x_ref: (1, C, tile_hw)   w_ref/b_ref: (1, C, 1)
    x = x_ref[...].astype(jnp.float32)
    mean = jnp.sum(x, axis=1, keepdims=True) * inv_c
    d = x - mean
    var = jnp.sum(d * d, axis=1, keepdims=True) * inv_c
    inv = jax.lax.rsqrt(var + eps)
    w = w_ref[...].astype(jnp.float32)
    b = b_ref[...].astype(jnp.float32)
    o_ref[...] = (d * inv * w + b).astype(o_ref.dtype)


def _layer_norm_channels_first(x, weight, bias, eps, *, target_bytes, vmem_limit,
                               min_steps):
    B, C, H, W = x.shape
    HW = H * W
    itemsize = x.dtype.itemsize
    per_b_steps = pl.cdiv(min_steps, B)

    if HW % 128 == 0:
        R = HW // 128
        x4 = x.reshape(B, C, R, 128)                # free view, no transpose
        tile_r = _pick_tile(R, C * 128 * (itemsize + 4), 8, target_bytes, per_b_steps)
        w4 = jnp.broadcast_to(weight.reshape(1, C, 1, 1).astype(jnp.float32),
                              (1, C, 1, 128))       # lane-dense resident copy
        b4 = jnp.broadcast_to(bias.reshape(1, C, 1, 1).astype(jnp.float32),
                              (1, C, 1, 128))
        kernel = functools.partial(_ln_cf4_kernel, eps=float(eps), inv_c=1.0 / C)
        y = pl.pallas_call(
            kernel,
            out_shape=jax.ShapeDtypeStruct((B, C, R, 128), x.dtype),
            grid_spec=pltpu.PrefetchScalarGridSpec(
                num_scalar_prefetch=0,
                grid=(B, pl.cdiv(R, tile_r)),
                in_specs=[
                    pl.BlockSpec((1, C, tile_r, 128), lambda b, j: (b, 0, j, 0)),
                    pl.BlockSpec((1, C, 1, 128), lambda b, j: (0, 0, 0, 0)),
                    pl.BlockSpec((1, C, 1, 128), lambda b, j: (0, 0, 0, 0)),
                ],
                out_specs=pl.BlockSpec((1, C, tile_r, 128), lambda b, j: (b, 0, j, 0)),
            ),
            compiler_params=pltpu.CompilerParams(
                dimension_semantics=("parallel", "parallel"),
                vmem_limit_bytes=vmem_limit),
        )(x4, w4, b4)
        return y.reshape(B, C, H, W)

    # Fallback for odd spatial sizes: C on the sublane axis (XLU reduce).
    x3 = x.reshape(B, C, HW)
    tile_hw = _pick_tile(HW, C * (itemsize + 4), 128, target_bytes, per_b_steps)
    w3 = weight.reshape(1, C, 1).astype(jnp.float32)
    b3 = bias.reshape(1, C, 1).astype(jnp.float32)
    kernel = functools.partial(_ln_cf3_kernel, eps=float(eps), inv_c=1.0 / C)
    y = pl.pallas_call(
        kernel,
        out_shape=jax.ShapeDtypeStruct((B, C, HW), x.dtype),
        grid_spec=pltpu.PrefetchScalarGridSpec(
            num_scalar_prefetch=0,
            grid=(B, pl.cdiv(HW, tile_hw)),
            in_specs=[
                pl.BlockSpec((1, C, tile_hw), lambda b, j: (b, 0, j)),
                pl.BlockSpec((1, C, 1), lambda b, j: (0, 0, 0)),
                pl.BlockSpec((1, C, 1), lambda b, j: (0, 0, 0)),
            ],
            out_specs=pl.BlockSpec((1, C, tile_hw), lambda b, j: (b, 0, j)),
        ),
        compiler_params=pltpu.CompilerParams(
            dimension_semantics=("parallel", "parallel"),
            vmem_limit_bytes=vmem_limit),
    )(x3, w3, b3)
    return y.reshape(B, C, H, W)


# ---------------------------------------------------------------------------
# Module mirror
# ---------------------------------------------------------------------------
class LayerNormPallas:
    """Mirror of the PyTorch LayerNorm module (channels_last / channels_first)."""

    def __init__(self, normalized_shape, eps=1e-6, data_format="channels_last",
                 weight=None, bias=None):
        if data_format not in ("channels_last", "channels_first"):
            raise NotImplementedError
        self.eps = eps
        self.data_format = data_format
        self.normalized_shape = (normalized_shape,)
        self.weight = (jnp.ones((normalized_shape,), jnp.float32)
                       if weight is None else weight)
        self.bias = (jnp.zeros((normalized_shape,), jnp.float32)
                     if bias is None else bias)
        self._target_bytes, self._vmem_limit, self._min_steps = _gen_params()

    def __call__(self, x):
        kw = dict(target_bytes=self._target_bytes, vmem_limit=self._vmem_limit,
                  min_steps=self._min_steps)
        if self.data_format == "channels_last":
            shp = x.shape
            C = shp[-1]
            x2d = x.reshape(-1, C)
            N = x2d.shape[0]
            use_packed = (0 < C < 128) and (128 % C == 0)
            if use_packed:
                G = 128 // C
                use_packed = G > 1 and (N % G == 0)
            if use_packed:
                y = _layer_norm_rows_packed(x2d, self.weight, self.bias, self.eps, **kw)
            else:
                # TODO(synk): N % G != 0 remainder could be handled without a
                # full fallback by splitting off the tail rows.
                y = _layer_norm_rows(x2d, self.weight, self.bias, self.eps, **kw)
            return y.reshape(shp)
        return _layer_norm_channels_first(x, self.weight, self.bias, self.eps, **kw)


# ---------------------------------------------------------------------------
# References + tests
# ---------------------------------------------------------------------------
def _ref_channels_last(x, w, b, eps):
    x = x.astype(jnp.float32)
    mean = jnp.mean(x, axis=-1, keepdims=True)
    var = jnp.mean((x - mean) ** 2, axis=-1, keepdims=True)
    return (x - mean) / jnp.sqrt(var + eps) * w + b


def _ref_channels_first(x, w, b, eps):
    x = x.astype(jnp.float32)
    u = jnp.mean(x, axis=1, keepdims=True)
    s = jnp.mean((x - u) ** 2, axis=1, keepdims=True)
    xn = (x - u) / jnp.sqrt(s + eps)
    return w[None, :, None, None] * xn + b[None, :, None, None]


if __name__ == "__main__":
    key = jax.random.PRNGKey(0)
    k1, k2, k3, k4, k5, k6, k7 = jax.random.split(key, 7)

    # ---- channels_last: (B, H, W, C) with C = 32 (packed MXU path) ----
    B, H, W, C_last = 2, 16, 16, 32
    x_last = jax.random.normal(k1, (B, H, W, C_last), jnp.float32)
    w_last = 1.0 + 0.1 * jax.random.normal(k2, (C_last,), jnp.float32)
    b_last = 0.1 * jax.random.normal(k3, (C_last,), jnp.float32)
    ln_last = LayerNormPallas(C_last, eps=1e-6, data_format="channels_last",
                              weight=w_last, bias=b_last)
    y_last = jax.block_until_ready(ln_last(x_last))
    ref_last = _ref_channels_last(x_last, w_last, b_last, 1e-6)
    assert jnp.max(jnp.abs(y_last - ref_last)) < 1e-4, "channels_last mismatch"

    # ---- channels_last with a nonzero mean offset (centered-variance check) ----
    x_off = x_last + 100.0
    y_off = jax.block_until_ready(ln_last(x_off))
    ref_off = _ref_channels_last(x_off, w_last, b_last, 1e-6)
    assert jnp.max(jnp.abs(y_off - ref_off)) < 5e-3, "offset channels_last mismatch"

    # ---- channels_last, ragged row count (exercises plain-path fallback) ----
    x_rag = jax.random.normal(k6, (3, 7, 5, C_last), jnp.float32)
    y_rag = jax.block_until_ready(ln_last(x_rag))
    ref_rag = _ref_channels_last(x_rag, w_last, b_last, 1e-6)
    assert jnp.max(jnp.abs(y_rag - ref_rag)) < 1e-4, "ragged channels_last mismatch"

    # ---- channels_last, bf16 I/O (f32 compute inside the kernel) ----
    x_bf16 = x_last.astype(jnp.bfloat16)
    y_bf16 = jax.block_until_ready(ln_last(x_bf16))
    assert y_bf16.dtype == jnp.bfloat16
    ref_bf16 = _ref_channels_last(x_bf16, w_last, b_last, 1e-6)
    assert jnp.max(jnp.abs(y_bf16.astype(jnp.float32) - ref_bf16)) < 8e-2, \
        "bf16 channels_last mismatch"

    # ---- channels_last, C = 128 (plain lane-wide path) ----
    x_128 = jax.random.normal(k7, (2, 8, 128), jnp.float32)
    ln_128 = LayerNormPallas(128, eps=1e-6, data_format="channels_last")
    y_128 = jax.block_until_ready(ln_128(x_128))
    ref_128 = _ref_channels_last(x_128, jnp.ones((128,)), jnp.zeros((128,)), 1e-6)
    assert jnp.max(jnp.abs(y_128 - ref_128)) < 1e-4, "C=128 channels_last mismatch"

    # ---- channels_first: (B, C, H, W) with C = 4 (4-D lane-dense path) ----
    C_first = 4
    x_first = jax.random.normal(k4, (B, C_first, H, W), jnp.float32)
    w_first = 1.0 + 0.1 * jax.random.normal(k5, (C_first,), jnp.float32)
    b_first = jnp.zeros((C_first,), jnp.float32)
    ln_first = LayerNormPallas(C_first, eps=1e-6, data_format="channels_first",
                               weight=w_first, bias=b_first)
    y_first = jax.block_until_ready(ln_first(x_first))
    ref_first = _ref_channels_first(x_first, w_first, b_first, 1e-6)
    assert jnp.max(jnp.abs(y_first - ref_first)) < 1e-4, "channels_first mismatch"

    # ---- channels_first, odd spatial size (3-D fallback path) ----
    x_odd = jax.random.normal(k6, (2, C_first, 5, 7), jnp.float32)
    y_odd = jax.block_until_ready(ln_first(x_odd))
    ref_odd = _ref_channels_first(x_odd, w_first, b_first, 1e-6)
    assert jnp.max(jnp.abs(y_odd - ref_odd)) < 1e-4, "odd channels_first mismatch"

    print("KERNEL_OK")
</pallas_src>

<mosaic_0001>
module attributes {stable_mosaic.version = 11 : i64} {
  func.func @_ln_rows_packed_kernel(%arg0: i32, %arg1: memref<128x128xf32, #tpu.memory_space<vmem>>, %arg2: memref<1x128xf32, #tpu.memory_space<vmem>>, %arg3: memref<1x128xf32, #tpu.memory_space<vmem>>, %arg4: memref<128x4xf32, #tpu.memory_space<vmem>>, %arg5: memref<4x128xf32, #tpu.memory_space<vmem>>, %arg6: memref<128x128xf32, #tpu.memory_space<vmem>>) attributes {dimension_semantics = [#tpu.dimension_semantics<parallel>], iteration_bounds = array<i64: 1>, scalar_prefetch = 0 : i64, scratch_operands = 0 : i64, tpu.core_type = #tpu.core_type<tc>, window_params = [{transform_indices = @transform_0, window_bounds = array<i64: 128, 128>}, {pipeline_mode = #tpu.pipeline_mode<synchronous>, transform_indices = @transform_1, window_bounds = array<i64: 1, 128>}, {pipeline_mode = #tpu.pipeline_mode<synchronous>, transform_indices = @transform_2, window_bounds = array<i64: 1, 128>}, {pipeline_mode = #tpu.pipeline_mode<synchronous>, transform_indices = @transform_3, window_bounds = array<i64: 128, 4>}, {pipeline_mode = #tpu.pipeline_mode<synchronous>, transform_indices = @transform_4, window_bounds = array<i64: 4, 128>}, {transform_indices = @transform_5, window_bounds = array<i64: 128, 128>}]} {
    %c0 = arith.constant 0 : index
    %c0_0 = arith.constant 0 : index
    %0 = vector.load %arg1[%c0, %c0_0] : memref<128x128xf32, #tpu.memory_space<vmem>>, vector<128x128xf32>
    %c0_1 = arith.constant 0 : index
    %c0_2 = arith.constant 0 : index
    %1 = vector.load %arg4[%c0_1, %c0_2] : memref<128x4xf32, #tpu.memory_space<vmem>>, vector<128x4xf32>
    %c0_3 = arith.constant 0 : index
    %c0_4 = arith.constant 0 : index
    %2 = vector.load %arg5[%c0_3, %c0_4] : memref<4x128xf32, #tpu.memory_space<vmem>>, vector<4x128xf32>
    %cst = arith.constant dense<0.000000e+00> : vector<128x4xf32>
    %3 = tpu.matmul %0, %1, %cst {dimension_numbers = #tpu.dot_dimension_numbers<[1], [0], [0], [1], [0, 0, 1, 1], [], []>} : vector<128x128xf32>, vector<128x4xf32>, vector<128x4xf32> -> vector<128x4xf32>
    %cst_5 = arith.constant 3.125000e-02 : f32
    %4 = vector.broadcast %cst_5 : f32 to vector<128x4xf32>
    %5 = arith.mulf %3, %4 : vector<128x4xf32>
    %cst_6 = arith.constant dense<0.000000e+00> : vector<128x128xf32>
    %6 = tpu.matmul %5, %2, %cst_6 {dimension_numbers = #tpu.dot_dimension_numbers<[1], [0], [0], [1], [0, 0, 1, 1], [], []>} : vector<128x4xf32>, vector<4x128xf32>, vector<128x128xf32> -> vector<128x128xf32>
    %7 = arith.subf %0, %6 : vector<128x128xf32>
    %8 = arith.mulf %7, %7 : vector<128x128xf32>
    %cst_7 = arith.constant dense<0.000000e+00> : vector<128x4xf32>
    %9 = tpu.matmul %8, %1, %cst_7 {dimension_numbers = #tpu.dot_dimension_numbers<[1], [0], [0], [1], [0, 0, 1, 1], [], []>} : vector<128x128xf32>, vector<128x4xf32>, vector<128x4xf32> -> vector<128x4xf32>
    %cst_8 = arith.constant 3.125000e-02 : f32
    %10 = vector.broadcast %cst_8 : f32 to vector<128x4xf32>
    %11 = arith.mulf %9, %10 : vector<128x4xf32>
    %cst_9 = arith.constant 9.99999997E-7 : f32
    %12 = vector.broadcast %cst_9 : f32 to vector<128x4xf32>
    %13 = arith.addf %11, %12 : vector<128x4xf32>
    %14 = math.rsqrt %13 : vector<128x4xf32>
    %cst_10 = arith.constant dense<0.000000e+00> : vector<128x128xf32>
    %15 = tpu.matmul %14, %2, %cst_10 {dimension_numbers = #tpu.dot_dimension_numbers<[1], [0], [0], [1], [0, 0, 1, 1], [], []>} : vector<128x4xf32>, vector<4x128xf32>, vector<128x128xf32> -> vector<128x128xf32>
    %c0_11 = arith.constant 0 : index
    %c0_12 = arith.constant 0 : index
    %16 = vector.load %arg2[%c0_11, %c0_12] : memref<1x128xf32, #tpu.memory_space<vmem>>, vector<1x128xf32>
    %c0_13 = arith.constant 0 : index
    %c0_14 = arith.constant 0 : index
    %17 = vector.load %arg3[%c0_13, %c0_14] : memref<1x128xf32, #tpu.memory_space<vmem>>, vector<1x128xf32>
    %18 = arith.mulf %7, %15 : vector<128x128xf32>
    %19 = vector.broadcast %16 : vector<1x128xf32> to vector<128x128xf32>
    %20 = arith.mulf %18, %19 : vector<128x128xf32>
    %21 = vector.broadcast %17 : vector<1x128xf32> to vector<128x128xf32>
    %22 = arith.addf %20, %21 : vector<128x128xf32>
    %c0_15 = arith.constant 0 : index
    %c0_16 = arith.constant 0 : index
    %23 = vector.load %arg6[%c0_15, %c0_16] : memref<128x128xf32, #tpu.memory_space<vmem>>, vector<128x128xf32>
    tpu.vector_store %arg6[%c0_15, %c0_16], %22 {strides = array<i32>} : memref<128x128xf32, #tpu.memory_space<vmem>>, vector<128x128xf32>,
    return
  }
  func.func @transform_0(%arg0: i32) -> (i32, i32) {
    %c0_i32 = arith.constant 0 : i32
    %c0_i32_0 = arith.constant 0 : i32
    return %arg0, %c0_i32 : i32, i32
  }
  func.func @transform_1(%arg0: i32) -> (i32, i32) {
    %c0_i32 = arith.constant 0 : i32
    %c0_i32_0 = arith.constant 0 : i32
    %c0_i32_1 = arith.constant 0 : i32
    return %c0_i32, %c0_i32_0 : i32, i32
  }
  func.func @transform_2(%arg0: i32) -> (i32, i32) {
    %c0_i32 = arith.constant 0 : i32
    %c0_i32_0 = arith.constant 0 : i32
    %c0_i32_1 = arith.constant 0 : i32
    return %c0_i32, %c0_i32_0 : i32, i32
  }
  func.func @transform_3(%arg0: i32) -> (i32, i32) {
    %c0_i32 = arith.constant 0 : i32
    %c0_i32_0 = arith.constant 0 : i32
    %c0_i32_1 = arith.constant 0 : i32
    return %c0_i32, %c0_i32_0 : i32, i32
  }
  func.func @transform_4(%arg0: i32) -> (i32, i32) {
    %c0_i32 = arith.constant 0 : i32
    %c0_i32_0 = arith.constant 0 : i32
    %c0_i32_1 = arith.constant 0 : i32
    return %c0_i32, %c0_i32_0 : i32, i32
  }
  func.func @transform_5(%arg0: i32) -> (i32, i32) {
    %c0_i32 = arith.constant 0 : i32
    %c0_i32_0 = arith.constant 0 : i32
    return %arg0, %c0_i32 : i32, i32
  }
}

</mosaic_0001>

<bundles_post_ra>
// kernel: tpu_custom_call.1
= control target key start
LH: loop header
LB: loop body
LE: loop exit
PB: predicated region body
PF: predicated region fallthrough
CT: control target
= control target key end

     0   :  { %10 = vsyncpa [#allocation3], 0  ;;  %s1782_s0 = inlined_call_operand.vmem [shape: f32[128,128], index: 0, kind: input, shape index: {}]   ;;  %s1783_s1 = inlined_call_operand.vmem [shape: f32[1,128], index: 1, kind: input, shape index: {}]   ;;  %s1784_s2 = inlined_call_operand.hbm [shape: f32[1,128], index: 2, kind: input, shape index: {}]   ;;  %s1785_s3 = inlined_call_operand.vmem [shape: f32[128,4], index: 3, kind: input, shape index: {}]   ;;  %s1786_s4 = inlined_call_operand.vmem [shape: f32[4,128], index: 4, kind: input, shape index: {}]   ;;  %s1787_s5 = inlined_call_operand.hbm [shape: f32[128,128], index: 5, kind: output, shape index: {}]  }
   0x1   :  { %11 = vsyncpa [#allocation4], 0  ;;  %s1318_s18 = smov [#allocation2]  }
   0x2   :  { %s22_s19 = sshll.u32 %s1318_s18, 4  ;;  %s23_s19 = int_to_ptr.vmem [resolvable:$true] %s22_s19 }
   0x3   :  { %s1282_s20 = scalar_lea.vmem %s23_s19, 16  ;;  %s1286_s21 = scalar_lea.vmem %s23_s19, 32 }
   0x4   :  { %p1283_p0 = scmp.ne.s32.totalorder %s23_s19, %s1282_s20  ;;  %p1287_p1 = scmp.lt.s32.totalorder %s23_s19, %s23_s19 }
   0x5   :  { %p1288_p2 = scmp.lt.s32.totalorder %s1286_s21, %s1282_s20 }
   0x7   :  { %p1289_p3 = por %p1288_p2, %p1287_p1 }
   0x9   :  { %p1290_p4 = pnand %p1289_p3, %p1283_p0 }
   0xb   :  { %1293 = shalt.err (!%p1290_p4)
}
   0xc   :  { %25 = dma.hbm_to_vmem [thread:$0]  %s1784_s2, 16, %s23_s19, [#allocation3]  }
   0xd   :  { %1314 = dma.done.wait [#allocation3], 16  }
   0xe   :  { %1315 = vsyncadd [#allocation3], 4294967280  ;;  %v1358_v0 = vld [vmem:[%s1785_s3 + $0x78] sm:$0xff]  ;;  %v1363_v1 = vld [vmem:[%s1785_s3 + $0x70] sm:$0xff]  ;;  %vm276_vm0 = vcmask 1043456   ;;  %vm227_vm1 = vcmask 31744  }
   0xf   :  { %1072 = vmatprep.subr.mxu0 %v1358_v0  ;;  %v1370_v2 = vld [vmem:[%s1785_s3 + $0x68] sm:$0xff]  ;;  %v1377_v3 = vld [vmem:[%s1785_s3 + $0x60] sm:$0xff]  ;;  %v1389_v5 = vld [vmem:[%s1785_s3 + $0x58] sm:$0xff] }
  0x10   :  { %1073 = vmatpush3.msra.mxu0 %v1358_v0  ;;  %v1383_v4 = vld [vmem:[%s1782_s0] sm:$0xff]  ;;  %v1397_v6 = vld [vmem:[%s1785_s3 + $0x50] sm:$0xff]  ;;  %v1404_v7 = vld [vmem:[%s1785_s3 + $0x48] sm:$0xff] }
  0x11   :  { %1074 = vmatprep.subr.mxu0 %v1363_v1  ;;  %1104 = vmatprep.mubr.f32.mxu0 %v1383_v4  ;;  %v1411_v8 = vld [vmem:[%s1785_s3 + $0x40] sm:$0xff]  ;;  %v1418_v9 = vld [vmem:[%s1785_s3 + $0x38] sm:$0xff]  ;;  %v1425_v10 = vld [vmem:[%s1785_s3 + $0x30] sm:$0xff] }
  0x12   :  { %1075 = vmatpush3.msra.mxu0 %v1363_v1  ;;  %v1432_v11 = vld [vmem:[%s1785_s3 + $0x28] sm:$0xff]  ;;  %v1439_v12 = vld [vmem:[%s1785_s3 + $0x20] sm:$0xff]  ;;  %v1446_v13 = vld [vmem:[%s1785_s3 + $0x18] sm:$0xff] }
  0x13   :  { %1076 = vmatprep.subr.mxu0 %v1370_v2  ;;  %v1453_v14 = vld [vmem:[%s1785_s3 + $0x10] sm:$0xff]  ;;  %v1460_v15 = vld [vmem:[%s1785_s3 + $0x8] sm:$0xff]  ;;  %v1467_v16 = vld [vmem:[%s1785_s3] sm:$0xff] }
  0x14   :  { %1077 = vmatpush3.msra.mxu0 %v1370_v2  ;;  %v1474_v17 = vld [vmem:[%s1782_s0 + $0x8] sm:$0xff]  ;;  %v1480_v18 = vld [vmem:[%s1782_s0 + $0x10] sm:$0xff]  ;;  %v1488_v19 = vld [vmem:[%s1782_s0 + $0x18] sm:$0xff] }
  0x15   :  { %1078 = vmatprep.subr.mxu0 %v1377_v3  ;;  %v1493_v20 = vld [vmem:[%s1782_s0 + $0x20] sm:$0xff]  ;;  %v1500_v21 = vld [vmem:[%s1782_s0 + $0x28] sm:$0xff]  ;;  %v1505_v22 = vld [vmem:[%s1782_s0 + $0x30] sm:$0xff] }
  0x16   :  { %1079 = vmatpush3.msra.mxu0 %v1377_v3  ;;  %v1512_v23 = vld [vmem:[%s1782_s0 + $0x38] sm:$0xff]  ;;  %v1517_v24 = vld [vmem:[%s1782_s0 + $0x40] sm:$0xff]  ;;  %v1524_v25 = vld [vmem:[%s1782_s0 + $0x48] sm:$0xff] }
  0x17   :  { %1080 = vmatprep.subr.mxu0 %v1389_v5  ;;  %v1529_v26 = vld [vmem:[%s1782_s0 + $0x50] sm:$0xff]  ;;  %v1536_v27 = vld [vmem:[%s1782_s0 + $0x58] sm:$0xff]  ;;  %v1541_v28 = vld [vmem:[%s1782_s0 + $0x60] sm:$0xff] }
  0x18   :  { %1081 = vmatpush3.msra.mxu0 %v1389_v5  ;;  %v1548_v29 = vld [vmem:[%s1782_s0 + $0x68] sm:$0xff]  ;;  %v1553_v30 = vld [vmem:[%s1782_s0 + $0x70] sm:$0xff]  ;;  %v1560_v31 = vld [vmem:[%s1782_s0 + $0x78] sm:$0xff] }
  0x19   :  { %1082 = vmatprep.subr.mxu0 %v1397_v6  ;;  %v1566_v32 = vld [vmem:[%s1786_s4] sm:$0xf] }
  0x1a   :  { %1083 = vmatpush3.msra.mxu0 %v1397_v6  ;;  %1128 = vmatprep.subr.msk.mxu1 %vm276_vm0, %v1566_v32 }
  0x1b   :  { %1084 = vmatprep.subr.mxu0 %v1404_v7  ;;  %1129 = vmatpush3.msk.msra.mxu1 %vm276_vm0, %v1566_v32 }
  0x1c   :  { %1085 = vmatpush3.msra.mxu0 %v1404_v7  ;;  %1154 = vmatprep.subr.mxu1 %v1358_v0 }
  0x1d   :  { %1086 = vmatprep.subr.mxu0 %v1411_v8 }
  0x1e   :  { %1087 = vmatpush3.msra.mxu0 %v1411_v8 }
  0x1f   :  { %1088 = vmatprep.subr.mxu0 %v1418_v9 }
  0x20   :  { %1089 = vmatpush3.msra.mxu0 %v1418_v9 }
  0x21   :  { %1090 = vmatprep.subr.mxu0 %v1425_v10 }
  0x22   :  { %1091 = vmatpush3.msra.mxu0 %v1425_v10 }
  0x23   :  { %1092 = vmatprep.subr.mxu0 %v1432_v11 }
  0x24   :  { %1093 = vmatpush3.msra.mxu0 %v1432_v11 }
  0x25   :  { %1094 = vmatprep.subr.mxu0 %v1439_v12 }
  0x26   :  { %1095 = vmatpush3.msra.mxu0 %v1439_v12 }
  0x27   :  { %1096 = vmatprep.subr.mxu0 %v1446_v13 }
  0x28   :  { %1097 = vmatpush3.msra.mxu0 %v1446_v13 }
  0x29   :  { %1098 = vmatprep.subr.mxu0 %v1453_v14 }
  0x2a   :  { %1099 = vmatpush3.msra.mxu0 %v1453_v14 }
  0x2b   :  { %1100 = vmatprep.subr.mxu0 %v1460_v15 }
  0x2c   :  { %1101 = vmatpush3.msra.mxu0 %v1460_v15 }
  0x2d   :  { %1102 = vmatprep.subr.mxu0 %v1467_v16 }
  0x2e   :  { %1103 = vmatpush3.msra.mxu0 %v1467_v16 }
  0x2f   :  { %1105 = vmatmul.mubr.f32.vlgmr.msra.gmra.mxu0 %v1474_v17  ;;  %1210 = vmatprep.subr.msk.mxu0 %vm276_vm0, %v1566_v32 }
  0x30   :  { %1107 = vmatprep.mubr.f32.mxu0 %v1480_v18  ;;  %1211 = vmatpush3.msk.msra.mxu0 %vm276_vm0, %v1566_v32 }
  0x33   :  { %1108 = vmatmul.mubr.f32.gmra.mxu0 %v1488_v19 }
  0x34   :  { %1110 = vmatprep.mubr.f32.mxu0 %v1493_v20 }
  0x37   :  { %1111 = vmatmul.mubr.f32.gmra.mxu0 %v1500_v21 }
  0x38   :  { %1113 = vmatprep.mubr.f32.mxu0 %v1505_v22 }
  0x3b   :  { %1114 = vmatmul.mubr.f32.gmra.mxu0 %v1512_v23 }
  0x3c   :  { %1116 = vmatprep.mubr.f32.mxu0 %v1517_v24 }
  0x3f   :  { %1117 = vmatmul.mubr.f32.gmra.mxu0 %v1524_v25 }
  0x40   :  { %1119 = vmatprep.mubr.f32.mxu0 %v1529_v26 }
  0x43   :  { %1120 = vmatmul.mubr.f32.gmra.mxu0 %v1536_v27 }
  0x44   :  { %1122 = vmatprep.mubr.f32.mxu0 %v1541_v28 }
  0x47   :  { %1123 = vmatmul.mubr.f32.gmra.mxu0 %v1548_v29 }
  0x48   :  { %1125 = vmatprep.mubr.f32.mxu0 %v1553_v30 }
  0x4b   :  { %1126 = vmatmul.mubr.f32.gmra.mxu0 %v1560_v31 }
  0xef   :  { %v1106_v33 = vpop.f32.mrf.mxu0 }
  0xf0   :  { %v212_v36 = vmul.f32 0.03125, %v1106_v33 }
  0xf1   :  { %v132_v34 = vpop.f32.mrf.mxu0 }
  0xf2   :  { %v211_v35 = vmul.f32 0.03125, %v132_v34 }
  0xf3   :  { %v1109_v37 = vpop.f32.mrf.mxu0 }
  0xf4   :  { %1130 = vmatprep.mubr.msk.f32.mxu1 %vm227_vm1, %v211_v35  ;;  %v214_v40 = vmul.f32 0.03125, %v1109_v37 }
  0xf5   :  { %v142_v38 = vpop.f32.mrf.mxu0  ;;  %1131 = vmatmul.mubr.msk.f32.vlgmr.msra.gmra.mxu1 %vm227_vm1, %v212_v36 }
  0xf6   :  { %v213_v39 = vmul.f32 0.03125, %v142_v38  ;;  %1155 = vmatpush3.msra.mxu1 %v1358_v0 }
  0xf7   :  { %v1112_v41 = vpop.f32.mrf.mxu0  ;;  %1156 = vmatprep.subr.mxu1 %v1363_v1 }
  0xf8   :  { %1133 = vmatprep.mubr.msk.f32.mxu1 %vm227_vm1, %v213_v39  ;;  %1157 = vmatpush3.msra.mxu1 %v1363_v1  ;;  %v216_v44 = vmul.f32 0.03125, %v1112_v41 }
  0xf9   :  { %v152_v42 = vpop.f32.mrf.mxu0  ;;  %1134 = vmatmul.mubr.msk.f32.gmra.mxu1 %vm227_vm1, %v214_v40  ;;  %1158 = vmatprep.subr.mxu1 %v1370_v2 }
  0xfa   :  { %v215_v43 = vmul.f32 0.03125, %v152_v42  ;;  %1159 = vmatpush3.msra.mxu1 %v1370_v2 }
  0xfb   :  { %v1115_v45 = vpop.f32.mrf.mxu0  ;;  %1160 = vmatprep.subr.mxu1 %v1377_v3 }
  0xfc   :  { %1136 = vmatprep.mubr.msk.f32.mxu1 %vm227_vm1, %v215_v43  ;;  %1161 = vmatpush3.msra.mxu1 %v1377_v3  ;;  %v218_v48 = vmul.f32 0.03125, %v1115_v45 }
  0xfd   :  { %v162_v46 = vpop.f32.mrf.mxu0  ;;  %1137 = vmatmul.mubr.msk.f32.gmra.mxu1 %vm227_vm1, %v216_v44  ;;  %1162 = vmatprep.subr.mxu1 %v1389_v5 }
  0xfe   :  { %v217_v47 = vmul.f32 0.03125, %v162_v46  ;;  %1163 = vmatpush3.msra.mxu1 %v1389_v5 }
  0xff   :  { %v1118_v49 = vpop.f32.mrf.mxu0  ;;  %1164 = vmatprep.subr.mxu1 %v1397_v6 }
 0x100   :  { %1139 = vmatprep.mubr.msk.f32.mxu1 %vm227_vm1, %v217_v47  ;;  %1165 = vmatpush3.msra.mxu1 %v1397_v6  ;;  %v220_v52 = vmul.f32 0.03125, %v1118_v49 }
 0x101   :  { %v172_v50 = vpop.f32.mrf.mxu0  ;;  %1140 = vmatmul.mubr.msk.f32.gmra.mxu1 %vm227_vm1, %v218_v48  ;;  %1166 = vmatprep.subr.mxu1 %v1404_v7 }
 0x102   :  { %v219_v51 = vmul.f32 0.03125, %v172_v50  ;;  %1167 = vmatpush3.msra.mxu1 %v1404_v7 }
 0x103   :  { %v1121_v53 = vpop.f32.mrf.mxu0  ;;  %1168 = vmatprep.subr.mxu1 %v1411_v8 }
 0x104   :  { %1142 = vmatprep.mubr.msk.f32.mxu1 %vm227_vm1, %v219_v51  ;;  %1169 = vmatpush3.msra.mxu1 %v1411_v8  ;;  %v222_v56 = vmul.f32 0.03125, %v1121_v53 }
 0x105   :  { %v182_v54 = vpop.f32.mrf.mxu0  ;;  %1143 = vmatmul.mubr.msk.f32.gmra.mxu1 %vm227_vm1, %v220_v52  ;;  %1170 = vmatprep.subr.mxu1 %v1418_v9 }
 0x106   :  { %v221_v55 = vmul.f32 0.03125, %v182_v54  ;;  %1171 = vmatpush3.msra.mxu1 %v1418_v9 }
 0x107   :  { %v1124_v57 = vpop.f32.mrf.mxu0  ;;  %1172 = vmatprep.subr.mxu1 %v1425_v10 }
 0x108   :  { %1145 = vmatprep.mubr.msk.f32.mxu1 %vm227_vm1, %v221_v55  ;;  %1173 = vmatpush3.msra.mxu1 %v1425_v10  ;;  %v224_v60 = vmul.f32 0.03125, %v1124_v57 }
 0x109   :  { %v192_v58 = vpop.f32.mrf.mxu0  ;;  %1146 = vmatmul.mubr.msk.f32.gmra.mxu1 %vm227_vm1, %v222_v56  ;;  %1174 = vmatprep.subr.mxu1 %v1432_v11 }
 0x10a   :  { %v223_v59 = vmul.f32 0.03125, %v192_v58  ;;  %1175 = vmatpush3.msra.mxu1 %v1432_v11 }
 0x10b   :  { %v1127_v61 = vpop.f32.mrf.mxu0  ;;  %1176 = vmatprep.subr.mxu1 %v1439_v12 }
 0x10c   :  { %1148 = vmatprep.mubr.msk.f32.mxu1 %vm227_vm1, %v223_v59  ;;  %1177 = vmatpush3.msra.mxu1 %v1439_v12  ;;  %v226_v0 = vmul.f32 0.03125, %v1127_v61 }
 0x10d   :  { %v202_v62 = vpop.f32.mrf.mxu0  ;;  %1149 = vmatmul.mubr.msk.f32.gmra.mxu1 %vm227_vm1, %v224_v60  ;;  %1178 = vmatprep.subr.mxu1 %v1446_v13 }
 0x10e   :  { %v225_v63 = vmul.f32 0.03125, %v202_v62  ;;  %1179 = vmatpush3.msra.mxu1 %v1446_v13 }
 0x10f   :  { %1180 = vmatprep.subr.mxu1 %v1453_v14 }
 0x110   :  { %1151 = vmatprep.mubr.msk.f32.mxu1 %vm227_vm1, %v225_v63  ;;  %1181 = vmatpush3.msra.mxu1 %v1453_v14 }
 0x111   :  { %1152 = vmatmul.mubr.msk.f32.gmra.mxu1 %vm227_vm1, %v226_v0  ;;  %1182 = vmatprep.subr.mxu1 %v1460_v15 }
 0x112   :  { %1183 = vmatpush3.msra.mxu1 %v1460_v15 }
 0x113   :  { %1184 = vmatprep.subr.mxu1 %v1467_v16 }
 0x114   :  { %1185 = vmatpush3.msra.mxu1 %v1467_v16 }
 0x115   :  { %1236 = vmatprep.subr.msk.mxu1 %vm276_vm0, %v1566_v32 }
 0x1b5   :  { %v1132_v1 = vpop.f32.mrf.mxu1 }
 0x1b6   :  { %v1627_v2 = vsub.f32 %v1474_v17, %v1132_v1 }
 0x1b7   :  { %v346_v3 = vpop.f32.mrf.mxu1 }
 0x1b8   :  { %v1630_v5 = vsub.f32 %v1383_v4, %v346_v3  ;;  %v442_v8 = vmul.f32 %v1627_v2, %v1627_v2 }
 0x1b9   :  { %v1135_v6 = vpop.f32.mrf.mxu1 }
 0x1ba   :  { %v441_v7 = vmul.f32 %v1630_v5, %v1630_v5  ;;  %v1637_v9 = vsub.f32 %v1488_v19, %v1135_v6 }
 0x1bb   :  { %v356_v10 = vpop.f32.mrf.mxu1 }
 0x1bc   :  { %v1640_v11 = vsub.f32 %v1480_v18, %v356_v10  ;;  %1186 = vmatprep.mubr.f32.mxu1 %v441_v7  ;;  %v444_v13 = vmul.f32 %v1637_v9, %v1637_v9 }
 0x1bd   :  { %v1138_v12 = vpop.f32.mrf.mxu1  ;;  %1187 = vmatmul.mubr.f32.vlgmr.msra.gmra.mxu1 %v442_v8 }
 0x1be   :  { %v443_v4 = vmul.f32 %v1640_v11, %v1640_v11  ;;  %1237 = vmatpush3.msk.msra.mxu1 %vm276_vm0, %v1566_v32  ;;  %v1649_v14 = vsub.f32 %v1500_v21, %v1138_v12 }
 0x1bf   :  { %v366_v15 = vpop.f32.mrf.mxu1 }
 0x1c0   :  { %v1652_v16 = vsub.f32 %v1493_v20, %v366_v15  ;;  %1189 = vmatprep.mubr.f32.mxu1 %v443_v4  ;;  %v446_v19 = vmul.f32 %v1649_v14, %v1649_v14 }
 0x1c1   :  { %v1141_v17 = vpop.f32.mrf.mxu1  ;;  %1190 = vmatmul.mubr.f32.gmra.mxu1 %v444_v13 }
 0x1c2   :  { %v445_v18 = vmul.f32 %v1652_v16, %v1652_v16  ;;  %v1659_v32 = vsub.f32 %v1512_v23, %v1141_v17 }
 0x1c3   :  { %v376_v33 = vpop.f32.mrf.mxu1 }
 0x1c4   :  { %v1662_v21 = vsub.f32 %v1505_v22, %v376_v33  ;;  %1192 = vmatprep.mubr.f32.mxu1 %v445_v18  ;;  %v448_v35 = vmul.f32 %v1659_v32, %v1659_v32 }
 0x1c5   :  { %v1144_v34 = vpop.f32.mrf.mxu1  ;;  %1193 = vmatmul.mubr.f32.gmra.mxu1 %v446_v19 }
 0x1c6   :  { %v447_v20 = vmul.f32 %v1662_v21, %v1662_v21  ;;  %v1669_v36 = vsub.f32 %v1524_v25, %v1144_v34 }
 0x1c7   :  { %v386_v37 = vpop.f32.mrf.mxu1 }
 0x1c8   :  { %v1672_v23 = vsub.f32 %v1517_v24, %v386_v37  ;;  %1195 = vmatprep.mubr.f32.mxu1 %v447_v20  ;;  %v450_v39 = vmul.f32 %v1669_v36, %v1669_v36 }
 0x1c9   :  { %v1147_v38 = vpop.f32.mrf.mxu1  ;;  %1196 = vmatmul.mubr.f32.gmra.mxu1 %v448_v35 }
 0x1ca   :  { %v449_v22 = vmul.f32 %v1672_v23, %v1672_v23  ;;  %v1679_v40 = vsub.f32 %v1536_v27, %v1147_v38 }
 0x1cb   :  { %v396_v41 = vpop.f32.mrf.mxu1 }
 0x1cc   :  { %v1682_v25 = vsub.f32 %v1529_v26, %v396_v41  ;;  %1198 = vmatprep.mubr.f32.mxu1 %v449_v22  ;;  %v452_v43 = vmul.f32 %v1679_v40, %v1679_v40 }
 0x1cd   :  { %v1150_v42 = vpop.f32.mrf.mxu1  ;;  %1199 = vmatmul.mubr.f32.gmra.mxu1 %v450_v39 }
 0x1ce   :  { %v451_v24 = vmul.f32 %v1682_v25, %v1682_v25  ;;  %v1689_v44 = vsub.f32 %v1548_v29, %v1150_v42 }
 0x1cf   :  { %v406_v45 = vpop.f32.mrf.mxu1 }
 0x1d0   :  { %v1692_v27 = vsub.f32 %v1541_v28, %v406_v45  ;;  %1201 = vmatprep.mubr.f32.mxu1 %v451_v24  ;;  %v454_v47 = vmul.f32 %v1689_v44, %v1689_v44 }
 0x1d1   :  { %v1153_v46 = vpop.f32.mrf.mxu1  ;;  %1202 = vmatmul.mubr.f32.gmra.mxu1 %v452_v43 }
 0x1d2   :  { %v453_v26 = vmul.f32 %v1692_v27, %v1692_v27  ;;  %v1699_v48 = vsub.f32 %v1560_v31, %v1153_v46 }
 0x1d3   :  { %v416_v49 = vpop.f32.mrf.mxu1 }
 0x1d4   :  { %v1702_v29 = vsub.f32 %v1553_v30, %v416_v49  ;;  %1204 = vmatprep.mubr.f32.mxu1 %v453_v26  ;;  %v456_v50 = vmul.f32 %v1699_v48, %v1699_v48 }
 0x1d5   :  { %1205 = vmatmul.mubr.f32.gmra.mxu1 %v454_v47 }
 0x1d6   :  { %v455_v28 = vmul.f32 %v1702_v29, %v1702_v29 }
 0x1d8   :  { %1207 = vmatprep.mubr.f32.mxu1 %v455_v28 }
 0x1d9   :  { %1208 = vmatmul.mubr.f32.gmra.mxu1 %v456_v50 }
 0x27d   :  { %v1188_v51 = vpop.f32.mrf.mxu1 }
 0x27e   :  { %v603_v52 = vmul.f32 0.03125, %v1188_v51 }
 0x27f   :  { %v523_v53 = vpop.f32.mrf.mxu1 }
 0x280   :  { %v602_v54 = vmul.f32 0.03125, %v523_v53  ;;  %v619_v31 = vadd.f32 1e-06, %v603_v52 }
 0x281   :  { %v1191_v55 = vpop.f32.mrf.mxu1 }
 0x282   :  { %v618_v56 = vadd.f32 1e-06, %v602_v54  ;;  %v605_v57 = vmul.f32 0.03125, %v1191_v55 }
 0x283   :  { %v533_v30 = vpop.f32.mrf.mxu1 }
 0x284   :  { %1242 = vrsqrt.f32 %v618_v56  ;;  %v604_v58 = vmul.f32 0.03125, %v533_v30  ;;  %v621_v59 = vadd.f32 1e-06, %v605_v57 }
 0x285   :  { %1244 = vrsqrt.f32 %v619_v31  ;;  %v1194_v60 = vpop.f32.mrf.mxu1 }
 0x286   :  { %v620_v61 = vadd.f32 1e-06, %v604_v58  ;;  %v607_v62 = vmul.f32 0.03125, %v1194_v60 }
 0x287   :  { %v543_v63 = vpop.f32.mrf.mxu1 }
 0x288   :  { %1246 = vrsqrt.f32 %v620_v61  ;;  %v606_v0 = vmul.f32 0.03125, %v543_v63  ;;  %v623_v1 = vadd.f32 1e-06, %v607_v62 }
 0x289   :  { %1248 = vrsqrt.f32 %v621_v59  ;;  %v1197_v3 = vpop.f32.mrf.mxu1 }
 0x28a   :  { %v622_v6 = vadd.f32 1e-06, %v606_v0  ;;  %v609_v7 = vmul.f32 0.03125, %v1197_v3  ;;  %v1727_v3 = vld [vmem:[%s1783_s1] ss:$0 sm:$0xff]  ;;  %s1319_s1 = smov [#allocation5]  }
 0x28b   :  { %v553_v8 = vpop.f32.mrf.mxu1  ;;  %s926_s10 = sshll.u32 %s1319_s1, 4  ;;  %s927_s10 = int_to_ptr.vmem [resolvable:$true] %s926_s10 }
 0x28c   :  { %1250 = vrsqrt.f32 %v622_v6  ;;  %v608_v10 = vmul.f32 0.03125, %v553_v8  ;;  %v625_v12 = vadd.f32 1e-06, %v609_v7  ;;  %v1730_v7 = vld [vmem:[#allocation2] ss:$0 sm:$0xff]  ;;  %s1294_s11 = scalar_lea.vmem %s927_s10, 2048  ;;  %p1299_p6 = scmp.lt.s32.totalorder %s927_s10, %s927_s10 }
 0x28d   :  { %1252 = vrsqrt.f32 %v623_v1  ;;  %v1200_v4 = vpop.f32.mrf.mxu1  ;;  %p1295_p5 = scmp.ne.s32.totalorder %s927_s10, %s1294_s11  ;;  %p1300_p7 = scmp.lt.s32.totalorder %s1294_s11, %s1294_s11 }
 0x28e   :  { %v624_v13 = vadd.f32 1e-06, %v608_v10  ;;  %v611_v15 = vmul.f32 0.03125, %v1200_v4 }
 0x28f   :  { %v563_v17 = vpop.f32.mrf.mxu1  ;;  %p1301_p8 = por %p1300_p7, %p1299_p6 }
 0x290   :  { %1254 = vrsqrt.f32 %v624_v13  ;;  %v610_v18 = vmul.f32 0.03125, %v563_v17  ;;  %v627_v33 = vadd.f32 1e-06, %v611_v15 }
 0x291   :  { %v1243_v19 = vpop.eup %1242  ;;  %1256 = vrsqrt.f32 %v625_v12  ;;  %v1203_v34 = vpop.f32.mrf.mxu1  ;;  %p1302_p9 = pnand %p1301_p8, %p1295_p5 }
 0x292   :  { %v1245_v20 = vpop.eup %1244  ;;  %v626_v35 = vadd.f32 1e-06, %v610_v18  ;;  %v613_v37 = vmul.f32 0.03125, %v1203_v34  ;;  %1212 = vmatprep.mubr.msk.f32.mxu0 %vm227_vm1, %v1243_v19 }
 0x293   :  { %v573_v38 = vpop.f32.mrf.mxu1  ;;  %1213 = vmatmul.mubr.msk.f32.vlgmr.msra.gmra.mxu0 %vm227_vm1, %v1245_v20 }
 0x294   :  { %1258 = vrsqrt.f32 %v626_v35  ;;  %v612_v22 = vmul.f32 0.03125, %v573_v38  ;;  %v629_v41 = vadd.f32 1e-06, %v613_v37 }
 0x295   :  { %v1247_v39 = vpop.eup %1246  ;;  %1260 = vrsqrt.f32 %v627_v33  ;;  %v1206_v42 = vpop.f32.mrf.mxu1 }
 0x296   :  { %v1249_v24 = vpop.eup %1248  ;;  %v628_v43 = vadd.f32 1e-06, %v612_v22  ;;  %v615_v45 = vmul.f32 0.03125, %v1206_v42  ;;  %1215 = vmatprep.mubr.msk.f32.mxu0 %vm227_vm1, %v1247_v39 }
 0x297   :  { %v583_v46 = vpop.f32.mrf.mxu1  ;;  %1216 = vmatmul.mubr.msk.f32.gmra.mxu0 %vm227_vm1, %v1249_v24 }
 0x298   :  { %1262 = vrsqrt.f32 %v628_v43  ;;  %v614_v26 = vmul.f32 0.03125, %v583_v46  ;;  %v631_v49 = vadd.f32 1e-06, %v615_v45 }
 0x299   :  { %v1251_v47 = vpop.eup %1250  ;;  %1264 = vrsqrt.f32 %v629_v41  ;;  %v1209_v28 = vpop.f32.mrf.mxu1 }
 0x29a   :  { %v1253_v50 = vpop.eup %1252  ;;  %v630_v51 = vadd.f32 1e-06, %v614_v26  ;;  %v617_v52 = vmul.f32 0.03125, %v1209_v28  ;;  %1218 = vmatprep.mubr.msk.f32.mxu0 %vm227_vm1, %v1251_v47 }
 0x29b   :  { %v593_v53 = vpop.f32.mrf.mxu1  ;;  %1219 = vmatmul.mubr.msk.f32.gmra.mxu0 %vm227_vm1, %v1253_v50 }
 0x29c   :  { %1266 = vrsqrt.f32 %v630_v51  ;;  %v616_v54 = vmul.f32 0.03125, %v593_v53  ;;  %v633_v55 = vadd.f32 1e-06, %v617_v52 }
 0x29d   :  { %v1255_v31 = vpop.eup %1254  ;;  %1268 = vrsqrt.f32 %v631_v49 }
 0x29e   :  { %v1257_v56 = vpop.eup %1256  ;;  %v632_v57 = vadd.f32 1e-06, %v616_v54  ;;  %1221 = vmatprep.mubr.msk.f32.mxu0 %vm227_vm1, %v1255_v31 }
 0x29f   :  { %1222 = vmatmul.mubr.msk.f32.gmra.mxu0 %vm227_vm1, %v1257_v56 }
 0x2a0   :  { %1270 = vrsqrt.f32 %v632_v57 }
 0x2a1   :  { %v1259_v30 = vpop.eup %1258  ;;  %1272 = vrsqrt.f32 %v633_v55 }
 0x2a2   :  { %v1261_v58 = vpop.eup %1260  ;;  %1224 = vmatprep.mubr.msk.f32.mxu0 %vm227_vm1, %v1259_v30 }
 0x2a3   :  { %1225 = vmatmul.mubr.msk.f32.gmra.mxu0 %vm227_vm1, %v1261_v58 }
 0x2a5   :  { %v1263_v59 = vpop.eup %1262 }
 0x2a6   :  { %v1265_v60 = vpop.eup %1264  ;;  %1227 = vmatprep.mubr.msk.f32.mxu1 %vm227_vm1, %v1263_v59 }
 0x2a7   :  { %1228 = vmatmul.mubr.msk.f32.vlgmr.msra.gmra.mxu1 %vm227_vm1, %v1265_v60 }
 0x2a9   :  { %v1267_v61 = vpop.eup %1266 }
 0x2aa   :  { %v1269_v62 = vpop.eup %1268  ;;  %1230 = vmatprep.mubr.msk.f32.mxu1 %vm227_vm1, %v1267_v61 }
 0x2ab   :  { %1231 = vmatmul.mubr.msk.f32.gmra.mxu1 %vm227_vm1, %v1269_v62 }
 0x2ad   :  { %v1271_v63 = vpop.eup %1270 }
 0x2ae   :  { %v1273_v0 = vpop.eup %1272  ;;  %1233 = vmatprep.mubr.msk.f32.mxu1 %vm227_vm1, %v1271_v63 }
 0x2af   :  { %1234 = vmatmul.mubr.msk.f32.gmra.mxu1 %vm227_vm1, %v1273_v0 }
 0x353   :  { %v1214_v1 = vpop.f32.mrf.mxu0 }
 0x354   :  { %v846_v6 = vmul.f32 %v1214_v1, %v1627_v2 }
 0x355   :  { %v764_v8 = vpop.f32.mrf.mxu0 }
 0x356   :  { %v868_v10 = vmul.f32 %v1727_v3, %v846_v6  ;;  %v845_v12 = vmul.f32 %v764_v8, %v1630_v5 }
 0x357   :  { %v1217_v4 = vpop.f32.mrf.mxu0 }
 0x358   :  { %v890_v13 = vadd.f32 %v1730_v7, %v868_v10  ;;  %v867_v15 = vmul.f32 %v1727_v3, %v845_v12  ;;  %v848_v17 = vmul.f32 %v1217_v4, %v1637_v9 }
 0x359   :  { %v774_v18 = vpop.f32.mrf.mxu0 }
 0x35a   :  { %906 = vst [vmem:[#allocation5 + $0x8] sm:$0xff] %v890_v13  ;;  %v889_v19 = vadd.f32 %v1730_v7, %v867_v15  ;;  %v870_v2 = vmul.f32 %v1727_v3, %v848_v17  ;;  %v847_v33 = vmul.f32 %v774_v18, %v1640_v11 }
 0x35b   :  { %v1220_v34 = vpop.f32.mrf.mxu0 }
 0x35c   :  { %905 = vst [vmem:[#allocation5] sm:$0xff] %v889_v19  ;;  %v892_v20 = vadd.f32 %v1730_v7, %v870_v2  ;;  %v869_v5 = vmul.f32 %v1727_v3, %v847_v33  ;;  %v850_v35 = vmul.f32 %v1220_v34, %v1649_v14 }
 0x35d   :  { %v784_v37 = vpop.f32.mrf.mxu0 }
 0x35e   :  { %908 = vst [vmem:[#allocation5 + $0x18] sm:$0xff] %v892_v20  ;;  %v891_v9 = vadd.f32 %v1730_v7, %v869_v5  ;;  %v872_v38 = vmul.f32 %v1727_v3, %v850_v35  ;;  %v849_v22 = vmul.f32 %v784_v37, %v1652_v16 }
 0x35f   :  { %v1223_v39 = vpop.f32.mrf.mxu0 }
 0x360   :  { %907 = vst [vmem:[#allocation5 + $0x10] sm:$0xff] %v891_v9  ;;  %v894_v11 = vadd.f32 %v1730_v7, %v872_v38  ;;  %v871_v41 = vmul.f32 %v1727_v3, %v849_v22  ;;  %v852_v42 = vmul.f32 %v1223_v39, %v1659_v32 }
 0x361   :  { %v794_v24 = vpop.f32.mrf.mxu0 }
 0x362   :  { %910 = vst [vmem:[#allocation5 + $0x28] sm:$0xff] %v894_v11  ;;  %v893_v14 = vadd.f32 %v1730_v7, %v871_v41  ;;  %v874_v43 = vmul.f32 %v1727_v3, %v852_v42  ;;  %v851_v45 = vmul.f32 %v794_v24, %v1662_v21 }
 0x363   :  { %v1226_v46 = vpop.f32.mrf.mxu0 }
 0x364   :  { %909 = vst [vmem:[#allocation5 + $0x20] sm:$0xff] %v893_v14  ;;  %v896_v16 = vadd.f32 %v1730_v7, %v874_v43  ;;  %v873_v26 = vmul.f32 %v1727_v3, %v851_v45  ;;  %v854_v47 = vmul.f32 %v1226_v46, %v1669_v36 }
 0x365   :  { %v804_v49 = vpop.f32.mrf.mxu0 }
 0x366   :  { %912 = vst [vmem:[#allocation5 + $0x38] sm:$0xff] %v896_v16  ;;  %v895_v32 = vadd.f32 %v1730_v7, %v873_v26  ;;  %v876_v28 = vmul.f32 %v1727_v3, %v854_v47  ;;  %v853_v50 = vmul.f32 %v804_v49, %v1672_v23 }
 0x367   :  { %v1229_v51 = vpop.f32.mrf.mxu1 }
 0x368   :  { %911 = vst [vmem:[#allocation5 + $0x30] sm:$0xff] %v895_v32  ;;  %v898_v21 = vadd.f32 %v1730_v7, %v876_v28  ;;  %v875_v52 = vmul.f32 %v1727_v3, %v853_v50  ;;  %v856_v53 = vmul.f32 %v1229_v51, %v1679_v40 }
 0x369   :  { %v814_v54 = vpop.f32.mrf.mxu1 }
 0x36a   :  { %914 = vst [vmem:[#allocation5 + $0x48] sm:$0xff] %v898_v21  ;;  %v897_v36 = vadd.f32 %v1730_v7, %v875_v52  ;;  %v878_v31 = vmul.f32 %v1727_v3, %v856_v53  ;;  %v855_v55 = vmul.f32 %v814_v54, %v1682_v25 }
 0x36b   :  { %v1232_v56 = vpop.f32.mrf.mxu1 }
 0x36c   :  { %913 = vst [vmem:[#allocation5 + $0x40] sm:$0xff] %v897_v36  ;;  %v900_v23 = vadd.f32 %v1730_v7, %v878_v31  ;;  %v877_v57 = vmul.f32 %v1727_v3, %v855_v55  ;;  %v858_v30 = vmul.f32 %v1232_v56, %v1689_v44 }
 0x36d   :  { %v824_v58 = vpop.f32.mrf.mxu1 }
 0x36e   :  { %916 = vst [vmem:[#allocation5 + $0x58] sm:$0xff] %v900_v23  ;;  %v899_v40 = vadd.f32 %v1730_v7, %v877_v57  ;;  %v880_v59 = vmul.f32 %v1727_v3, %v858_v30  ;;  %v857_v60 = vmul.f32 %v824_v58, %v1692_v27 }
 0x36f   :  { %v1235_v61 = vpop.f32.mrf.mxu1 }
 0x370   :  { %915 = vst [vmem:[#allocation5 + $0x50] sm:$0xff] %v899_v40  ;;  %v902_v25 = vadd.f32 %v1730_v7, %v880_v59  ;;  %v879_v62 = vmul.f32 %v1727_v3, %v857_v60  ;;  %v860_v63 = vmul.f32 %v1235_v61, %v1699_v48 }
 0x371   :  { %v834_v0 = vpop.f32.mrf.mxu1 }
 0x372   :  { %918 = vst [vmem:[#allocation5 + $0x68] sm:$0xff] %v902_v25  ;;  %v901_v44 = vadd.f32 %v1730_v7, %v879_v62  ;;  %v882_v1 = vmul.f32 %v1727_v3, %v860_v63  ;;  %v859_v6 = vmul.f32 %v834_v0, %v1702_v29 }
 0x374   :  { %917 = vst [vmem:[#allocation5 + $0x60] sm:$0xff] %v901_v44  ;;  %v904_v27 = vadd.f32 %v1730_v7, %v882_v1  ;;  %v881_v8 = vmul.f32 %v1727_v3, %v859_v6 }
 0x376   :  { %920 = vst [vmem:[#allocation5 + $0x78] sm:$0xff] %v904_v27  ;;  %v903_v10 = vadd.f32 %v1730_v7, %v881_v8 }
 0x378   :  { %919 = vst [vmem:[#allocation5 + $0x70] sm:$0xff] %v903_v10 }
 0x379   :  { %1305 = shalt.err (!%p1302_p9)
}
 0x37a   :  { %s1320_s12 = smov 128   ;;  %s1321_s13 = smov 8  }
 0x37b   :  { %932 = dma.vmem_to_hbm [thread:$0]  %s927_s10, 2048, %s1787_s5, [#allocation4], %s1320_s12, %s1320_s12, %s1321_s13  }
 0x37c   :  { %1316 = dma.done.wait [#allocation4], 2048  }
 0x37d   :  { %1317 = vsyncadd [#allocation4], 4294965248 }
 0x37e   :  { %936 = vsyncpa [#allocation3], 1 }
 0x37f   :  { %937 = vsyncpa [#allocation4], 1 }

</bundles_post_ra>
